<compile_context>
chip_gen: v7x
topology: tpu7x:2x2x1
jax: 0.10.0
libtpu: 0.0.40
codegen_flags: <defaults>
</compile_context>

<pallas_src>
import jax
import jax.numpy as jnp
from jax import lax
from jax.experimental import pallas as pl
from jax.experimental.pallas import tpu as pltpu


def _linear_kernel(x_ref, w_ref, o_ref):
    # x_ref: (tb, D) batch tile; w_ref: (1, D) lane-dense weight;
    # o_ref: (1, tb) lane-dense row of per-row dot products.
    # Contract both last dims ('od,bd->ob'): the batch index lands on the lane
    # axis of the result, so the store is a dense, unmasked vst.
    o_ref[...] = lax.dot_general(
        w_ref[...],
        x_ref[...],
        dimension_numbers=(((1,), (1,)), ((), ())),
        precision=lax.Precision.HIGHEST,
        preferred_element_type=jnp.float32,
    ).astype(o_ref.dtype)


def _round_up(x: int, m: int) -> int:
    return (x + m - 1) // m * m


def _vmem_capacity_bytes() -> int:
    try:
        return int(pltpu.get_tpu_info().vmem_capacity_bytes)
    except Exception:
        return 64 * 1024 * 1024  # v7x per-TensorCore floor; safe everywhere.


def linear_feature_forward(x: jax.Array, w: jax.Array, *, block_bytes: int | None = None) -> jax.Array:
    """Computes x @ w.T with x: [..., D], w: [1, D] -> [..., 1] (nn.Linear(D, 1, bias=False))."""
    orig_shape = x.shape
    D = orig_shape[-1]
    assert w.shape == (1, D), f"expected weight (1, {D}), got {w.shape}"

    xf = x.reshape(-1, D)  # flatten leading dims (metadata-only for contiguous x)
    B = xf.shape[0]

    dtype_bytes = jnp.dtype(xf.dtype).itemsize
    sub = max(8, 32 // dtype_bytes)  # sublane pack: f32 -> 8, bf16 -> 16, int8 -> 32
    row_bytes = D * dtype_bytes

    vmem_cap = _vmem_capacity_bytes()
    if block_bytes is None:
        # ~8 MiB per x buffer (double-buffered) amortizes the per-step overhead
        # while keeping 2 buffers + output well inside v7x's 64 MiB per TC.
        block_bytes = max(1 << 20, min(8 << 20, vmem_cap // 8))

    # Largest 128-row-aligned batch tile within the per-buffer byte budget.
    tb_budget = max(128, (block_bytes // row_bytes) // 128 * 128)

    if B <= 256:
        # Single small block: one grid step, sublane-aligned tile, no padding copy.
        tb = _round_up(max(B, 1), sub)
        n = 1
    else:
        # Aim for >= 4 grid steps (>= 2 per v7x TensorCore), blocks >= 128 rows,
        # and never exceed the per-buffer byte budget.
        tb = min(tb_budget, max(128, _round_up(pl.cdiv(B, 4), 128)))
        n = pl.cdiv(B, tb)
        if n > 1 and n % 2 == 1:
            # Rebalance to an even step count so both v7x TCs get equal work.
            tb_dn = _round_up(pl.cdiv(B, n - 1), 128)  # fewer, bigger steps
            tb_up = _round_up(pl.cdiv(B, n + 1), 128)  # more, smaller steps
            if tb_dn <= tb_budget and pl.cdiv(B, tb_dn) % 2 == 0:
                tb = tb_dn
            elif pl.cdiv(B, tb_up) % 2 == 0:
                tb = tb_up
            n = pl.cdiv(B, tb)

    # Scoped-VMEM limit: double-buffered x tile + (sublane-padded) weight +
    # lane-dense output buffers + headroom; clamped below the chip's capacity.
    vmem_needed = 2 * tb * row_bytes + 2 * 32 * D + 2 * 32 * tb + (2 << 20)
    vmem_limit = int(min(max(vmem_needed, 32 << 20), max(vmem_cap - (8 << 20), 32 << 20)))

    cost = pl.CostEstimate(
        flops=2 * B * D,
        transcendentals=0,
        bytes_accessed=(B * D + D + B) * dtype_bytes,
    )

    out = pl.pallas_call(
        _linear_kernel,
        out_shape=jax.ShapeDtypeStruct((1, n * tb), xf.dtype),
        grid_spec=pltpu.PrefetchScalarGridSpec(
            num_scalar_prefetch=0,
            grid=(n,),
            in_specs=[
                pl.BlockSpec((tb, D), lambda i: (i, 0)),  # x batch tile
                # Constant index_map: the tiny (1, D) weight is fetched once
                # and reused across all grid steps.
                pl.BlockSpec((1, D), lambda i: (0, 0)),
            ],
            out_specs=pl.BlockSpec((1, tb), lambda i: (0, i)),  # lane-dense row
        ),
        compiler_params=pltpu.CompilerParams(
            dimension_semantics=("parallel",),
            vmem_limit_bytes=vmem_limit,
        ),
        cost_estimate=cost,
    )(xf, w)

    # Drop garbage lanes from the ragged last block and restore leading dims.
    return out[0, :B].reshape(orig_shape[:-1] + (1,))


if __name__ == "__main__":
    input_dim = 128
    batch = 8

    key = jax.random.PRNGKey(0)
    kx, kw, kx2, kx3 = jax.random.split(key, 4)

    # Deterministic init mimicking nn.Linear's uniform(-1/sqrt(D), 1/sqrt(D));
    # torch weight shape is (out_features=1, in_features=input_dim).
    bound = 1.0 / (input_dim ** 0.5)
    w = jax.random.uniform(kw, (1, input_dim), dtype=jnp.float32, minval=-bound, maxval=bound)

    x = jax.random.normal(kx, (batch, input_dim), dtype=jnp.float32)
    out = jax.block_until_ready(linear_feature_forward(x, w))
    ref = jnp.sum(x * w, axis=-1, keepdims=True)  # exact f32 elementwise reference
    assert out.shape == (batch, 1)
    assert jnp.allclose(out, ref, atol=1e-4, rtol=1e-4)

    # Ragged, multi-step batch: exercises the cdiv grid + OOB-padded last block
    # + even-step rebalance (no host-side padding of x).
    x2 = jax.random.normal(kx2, (300, input_dim), dtype=jnp.float32)
    out2 = jax.block_until_ready(linear_feature_forward(x2, w))
    assert out2.shape == (300, 1)
    assert jnp.allclose(out2, jnp.sum(x2 * w, axis=-1, keepdims=True), atol=1e-4, rtol=1e-4)

    # Leading-dims input (nn.Linear semantics on [..., D]).
    x3 = jax.random.normal(kx3, (2, 5, input_dim), dtype=jnp.float32)
    out3 = jax.block_until_ready(linear_feature_forward(x3, w))
    assert out3.shape == (2, 5, 1)
    assert jnp.allclose(out3, jnp.sum(x3 * w[0], axis=-1, keepdims=True), atol=1e-4, rtol=1e-4)

    print("KERNEL_OK")
</pallas_src>

<mosaic_0001>
module attributes {stable_mosaic.version = 11 : i64} {
  func.func @_linear_kernel(%arg0: i32, %arg1: memref<8x128xf32, #tpu.memory_space<vmem>>, %arg2: memref<1x128xf32, #tpu.memory_space<vmem>>, %arg3: memref<1x8xf32, #tpu.memory_space<vmem>>) attributes {dimension_semantics = [#tpu.dimension_semantics<parallel>], iteration_bounds = array<i64: 1>, scalar_prefetch = 0 : i64, scratch_operands = 0 : i64, tpu.core_type = #tpu.core_type<tc>, window_params = [{transform_indices = @transform_0, window_bounds = array<i64: 8, 128>}, {pipeline_mode = #tpu.pipeline_mode<synchronous>, transform_indices = @transform_1, window_bounds = array<i64: 1, 128>}, {transform_indices = @transform_2, window_bounds = array<i64: 1, 8>}]} {
    %c0 = arith.constant 0 : index
    %c0_0 = arith.constant 0 : index
    %0 = vector.load %arg2[%c0, %c0_0] : memref<1x128xf32, #tpu.memory_space<vmem>>, vector<1x128xf32>
    %c0_1 = arith.constant 0 : index
    %c0_2 = arith.constant 0 : index
    %1 = vector.load %arg1[%c0_1, %c0_2] : memref<8x128xf32, #tpu.memory_space<vmem>>, vector<8x128xf32>
    %cst = arith.constant dense<0.000000e+00> : vector<1x8xf32>
    %2 = tpu.matmul %0, %1, %cst {dimension_numbers = #tpu.dot_dimension_numbers<[1], [1], [0], [0], [0, 0, 1, 0], [], []>, precision = #tpu.contract_precision<fp32>} : vector<1x128xf32>, vector<8x128xf32>, vector<1x8xf32> -> vector<1x8xf32>
    %c0_3 = arith.constant 0 : index
    %c0_4 = arith.constant 0 : index
    %3 = vector.load %arg3[%c0_3, %c0_4] : memref<1x8xf32, #tpu.memory_space<vmem>>, vector<1x8xf32>
    tpu.vector_store %arg3[%c0_3, %c0_4], %2 {strides = array<i32>} : memref<1x8xf32, #tpu.memory_space<vmem>>, vector<1x8xf32>,
    return
  }
  func.func @transform_0(%arg0: i32) -> (i32, i32) {
    %c0_i32 = arith.constant 0 : i32
    %c0_i32_0 = arith.constant 0 : i32
    return %arg0, %c0_i32 : i32, i32
  }
  func.func @transform_1(%arg0: i32) -> (i32, i32) {
    %c0_i32 = arith.constant 0 : i32
    %c0_i32_0 = arith.constant 0 : i32
    %c0_i32_1 = arith.constant 0 : i32
    return %c0_i32, %c0_i32_0 : i32, i32
  }
  func.func @transform_2(%arg0: i32) -> (i32, i32) {
    %c0_i32 = arith.constant 0 : i32
    %c0_i32_0 = arith.constant 0 : i32
    return %c0_i32, %arg0 : i32, i32
  }
}

</mosaic_0001>

<bundles_post_ra>
// kernel: tpu_custom_call.1
= control target key start
LH: loop header
LB: loop body
LE: loop exit
PB: predicated region body
PF: predicated region fallthrough
CT: control target
= control target key end

     0   :  { %7 = vsyncpa [#allocation3], 0  ;;  %s644_s0 = inlined_call_operand.hbm [shape: f32[8,128], index: 0, kind: input, shape index: {}]   ;;  %s645_s1 = inlined_call_operand.vmem [shape: f32[1,128], index: 1, kind: input, shape index: {}]   ;;  %s646_s2 = inlined_call_operand.hbm [shape: f32[1,8], index: 2, kind: output, shape index: {}]  }
   0x1   :  { %8 = vsyncpa [#allocation4], 0  ;;  %s592_s9 = smov [#allocation2]   ;;  %s544_s13 = scalar_lea.hbm %s644_s0, 128 }
   0x2   :  { %s15_s10 = sshll.u32 %s592_s9, 4  ;;  %p545_p0 = scmp.ne.s32.totalorder %s644_s0, %s544_s13  ;;  %s16_s10 = int_to_ptr.vmem [resolvable:$true] %s15_s10 }
   0x3   :  { %p548_p1 = scmp.lt.u32.totalorder %s544_s13, %s644_s0 }
   0x5   :  { %p550_p2 = pnand %p548_p1, %p545_p0 }
   0x7   :  { %553 = shalt.err (!%p550_p2)
}
   0x8   :  { %s554_s18 = scalar_lea.vmem %s16_s10, 128  ;;  %p559_p4 = scmp.lt.s32.totalorder %s16_s10, %s16_s10 }
   0x9   :  { %p555_p3 = scmp.ne.s32.totalorder %s16_s10, %s554_s18  ;;  %p560_p5 = scmp.lt.s32.totalorder %s554_s18, %s554_s18 }
   0xb   :  { %p561_p6 = por %p560_p5, %p559_p4 }
   0xd   :  { %p562_p7 = pnand %p561_p6, %p555_p3 }
   0xf   :  { %565 = shalt.err (!%p562_p7)
}
  0x10   :  { %18 = dma.hbm_to_vmem [thread:$0]  %s644_s0, 128, %s16_s10, [#allocation3]  }
  0x11   :  { %588 = dma.done.wait [#allocation3], 128  }
  0x12   :  { %589 = vsyncadd [#allocation3], 4294967168  ;;  %v593_v0 = vmov 0.0   ;;  %vm594_vm0 = vmmov 0   ;;  %v25_v1 = vld [vmem:[#allocation2] sm:$0xff]  ;;  %s595_s0 = smov [#allocation5]  }
  0x13   :  { %516 = vmatprep.subr.mxu0 %v593_v0  ;;  %501 = vmatprep.subr.mxu1 %v593_v0  ;;  %v24_v2 = vld [vmem:[%s645_s1] sm:$0x1]  ;;  %v27_v3 = vand.u32 4294901760, %v25_v1  ;;  %s480_s1 = sshll.u32 %s595_s0, 4  ;;  %vm472_vm1 = vcmask 57344   ;;  %s481_s1 = int_to_ptr.vmem [resolvable:$true] %s480_s1 }
  0x14   :  { %518 = vmatprep.mubr.msk.f32.mxu0 %vm594_vm0, %v593_v0  ;;  %503 = vmatprep.mubr.msk.f32.mxu1 %vm594_vm0, %v593_v0  ;;  %v92_v4 = vand.u32 4294901760, %v24_v2  ;;  %s566_s23 = scalar_lea.vmem %s481_s1, 16  ;;  %s570_s24 = scalar_lea.vmem %s481_s1, 32 }
  0x15   :  { %v104_v5 = vsub.f32 %v25_v1, %v27_v3  ;;  %517 = vmatpush3.xpose.msra.mxu0 %v27_v3  ;;  %502 = vmatpush3.xpose.msra.mxu1 %v27_v3  ;;  %p567_p8 = scmp.ne.s32.totalorder %s481_s1, %s566_s23  ;;  %p571_p9 = scmp.lt.s32.totalorder %s481_s1, %s481_s1 }
  0x16   :  { %v93_v6 = vsub.f32 %v24_v2, %v92_v4  ;;  %506 = vmatprep.subr.mxu1 %v593_v0  ;;  %521 = vmatprep.subr.mxu0 %v593_v0  ;;  %p572_p10 = scmp.lt.s32.totalorder %s570_s24, %s566_s23 }
  0x17   :  { %v105_v8 = vand.u32 4294901760, %v104_v5 }
  0x18   :  { %v94_v7 = vand.u32 4294901760, %v93_v6  ;;  %p573_p11 = por %p572_p10, %p571_p9 }
  0x19   :  { %v106_v10 = vsub.f32 %v104_v5, %v105_v8 }
  0x1a   :  { %519 = vmatmul.mubr.f32.vlgmr.msra.gmra.mrb[0].mxu0 %v94_v7  ;;  %v95_v9 = vsub.f32 %v93_v6, %v94_v7  ;;  %p574_p12 = pnand %p573_p11, %p567_p8 }
  0x1b   :  { %522 = vmatpush3.xpose.msra.mxu0 %v105_v8  ;;  %523 = vmatprep.mubr.msk.f32.mxu0 %vm594_vm0, %v593_v0  ;;  %v107_v12 = vand.u32 4294901760, %v106_v10 }
  0x1c   :  { %v96_v11 = vand.u32 4294901760, %v95_v9  ;;  %526 = vmatprep.subr.mxu0 %v593_v0 }
  0x1e   :  { %504 = vmatmul.mubr.f32.vlgmr.msra.gmra.mrb[0].mxu1 %v96_v11 }
  0x1f   :  { %507 = vmatpush3.xpose.msra.mxu1 %v107_v12  ;;  %508 = vmatprep.mubr.msk.f32.mxu1 %vm594_vm0, %v593_v0 }
  0x20   :  { %511 = vmatprep.subr.mxu1 %v593_v0 }
  0x22   :  { %524 = vmatmul.mubr.f32.vlgmr.msra.gmra.mrb[0].mxu0 %v92_v4 }
  0x23   :  { %527 = vmatpush3.xpose.msra.mxu0 %v27_v3  ;;  %528 = vmatprep.mubr.msk.f32.mxu0 %vm594_vm0, %v593_v0 }
  0x26   :  { %509 = vmatmul.mubr.f32.vlgmr.msra.gmra.mrb[0].mxu1 %v92_v4 }
  0x27   :  { %512 = vmatpush3.xpose.msra.mxu1 %v104_v5  ;;  %513 = vmatprep.mubr.msk.f32.mxu1 %vm594_vm0, %v593_v0 }
  0x2a   :  { %529 = vmatmul.mubr.f32.vlgmr.msra.gmra.mrb[0].mxu0 %v92_v4 }
  0x2e   :  { %514 = vmatmul.mubr.f32.vlgmr.msra.gmra.mrb[0].mxu1 %v93_v6 }
  0xfd   :  { %v468_v13 = vpop.f32.mrb[0].mxu0 }
  0xfe   :  { %v530_v14 = vpop.f32.mrb[1].mxu0 }
 0x101   :  { %v248_v15 = vpop.f32.mrb[0].mxu1 }
 0x102   :  { %v531_v16 = vadd.f32 %v468_v13, %v248_v15  ;;  %v515_v17 = vpop.f32.mrb[1].mxu1 }
 0x104   :  { %473 = vst.msk [vmem:[#allocation5] sm:$0x1] %vm472_vm1, %v531_v16 }
 0x105   :  { %577 = shalt.err (!%p574_p12)
}
 0x106   :  { %s578_s27 = scalar_lea.hbm %s646_s2, 16 }
 0x107   :  { %p579_p13 = scmp.ne.s32.totalorder %s646_s2, %s578_s27  ;;  %p582_p0 = scmp.lt.u32.totalorder %s578_s27, %s646_s2 }
 0x109   :  { %p584_p1 = pnand %p582_p0, %p579_p13 }
 0x10b   :  { %587 = shalt.err (!%p584_p1)
}
 0x10c   :  { %483 = dma.vmem_to_hbm [thread:$0]  %s481_s1, 16, %s646_s2, [#allocation4]  }
 0x10d   :  { %590 = dma.done.wait [#allocation4], 16  }
 0x10e   :  { %591 = vsyncadd [#allocation4], 4294967280 }
 0x10f   :  { %487 = vsyncpa [#allocation3], 1 }
 0x110   :  { %488 = vsyncpa [#allocation4], 1 }

</bundles_post_ra>
